<compile_context>
chip_gen: v7x
topology: tpu7x:2x2x1
jax: 0.10.0
libtpu: 0.0.40
codegen_flags: <defaults>
</compile_context>

<pallas_src>
import functools

import jax
import jax.numpy as jnp
from jax import lax
from jax.experimental import pallas as pl
from jax.experimental.pallas import tpu as pltpu


# ---------------------------------------------------------------------------
# Kernels
# ---------------------------------------------------------------------------

def _sdpa_attn_kernel(q_ref, k_ref, v_ref, out_ref, attn_ref, *,
                      inv_temperature, mxu_dtype):
    """Single-pass SDPA that also writes the normalized attention matrix.

    Blocks: q (G, TQ, Dk), k (G, Lk, Dk), v (G, Lk, Dv),
            out (G, TQ, Dv), attn (G, TQ, Lk).
    """
    q = q_ref[...] * inv_temperature        # scale the smaller (TQ, Dk) tensor
    k = k_ref[...]
    v = v_ref[...]
    if mxu_dtype is not None:
        q = q.astype(mxu_dtype)
        k = k.astype(mxu_dtype)
        v = v.astype(mxu_dtype)

    # scores (G, TQ, Lk): contract head-dim directly (no k transpose pass).
    s = lax.dot_general(
        q, k,
        dimension_numbers=(((2,), (2,)), ((0,), (0,))),
        preferred_element_type=jnp.float32,
    )

    # Numerically-stable softmax statistics in f32.
    m = jnp.max(s, axis=-1, keepdims=True)
    p = jnp.exp(s - m)
    denom = jnp.sum(p, axis=-1, keepdims=True)
    inv = 1.0 / denom                       # exact: returned attn rows sum to 1

    # output (G, TQ, Dv): unnormalized p @ v, then a cheap O(TQ*Dv) scale.
    pv = lax.dot_general(
        p.astype(v.dtype), v,
        dimension_numbers=(((2,), (1,)), ((0,), (0,))),
        preferred_element_type=jnp.float32,
    )
    out_ref[...] = (pv * inv).astype(out_ref.dtype)
    attn_ref[...] = (p * inv).astype(attn_ref.dtype)


def _sdpa_flash_kernel(q_ref, k_ref, v_ref, out_ref, m_sc, l_sc, acc_sc, *,
                       inv_temperature, mxu_dtype):
    """Online-softmax SDPA (no attention writeback). KV axis is grid axis 2.

    Blocks: q (G, TQ, Dk), k (G, TK, Dk), v (G, TK, Dv), out (G, TQ, Dv).
    Scratch: m/l (G, TQ, 1) f32, acc (G, TQ, Dv) f32.
    """
    kv = pl.program_id(2)

    @pl.when(kv == 0)
    def _():
        m_sc[...] = jnp.full_like(m_sc, -jnp.inf)
        l_sc[...] = jnp.zeros_like(l_sc)
        acc_sc[...] = jnp.zeros_like(acc_sc)

    q = q_ref[...] * inv_temperature
    k = k_ref[...]
    v = v_ref[...]
    if mxu_dtype is not None:
        q = q.astype(mxu_dtype)
        k = k.astype(mxu_dtype)
        v = v.astype(mxu_dtype)

    s = lax.dot_general(
        q, k,
        dimension_numbers=(((2,), (2,)), ((0,), (0,))),
        preferred_element_type=jnp.float32,
    )

    m_prev = m_sc[...]
    m_new = jnp.maximum(m_prev, jnp.max(s, axis=-1, keepdims=True))
    alpha = jnp.exp(m_prev - m_new)
    p = jnp.exp(s - m_new)

    l_sc[...] = alpha * l_sc[...] + jnp.sum(p, axis=-1, keepdims=True)
    pv = lax.dot_general(
        p.astype(v.dtype), v,
        dimension_numbers=(((2,), (1,)), ((0,), (0,))),
        preferred_element_type=jnp.float32,
    )
    acc_sc[...] = alpha * acc_sc[...] + pv
    m_sc[...] = m_new

    @pl.when(kv == pl.num_programs(2) - 1)
    def _():
        # Deferred normalization: one O(TQ*Dv) multiply, approx reciprocal on EUP.
        out_ref[...] = (acc_sc[...]
                        * pl.reciprocal(l_sc[...], approx=True)).astype(out_ref.dtype)


# ---------------------------------------------------------------------------
# Tiling heuristics (generation-aware VMEM budgeting)
# ---------------------------------------------------------------------------

def _vmem_limit_bytes():
    """Per-TensorCore VMEM budget for the pipeline, with headroom."""
    try:
        cap = int(pltpu.get_tpu_info().vmem_capacity_bytes)
    except Exception:
        cap = 64 << 20  # conservative fallback: v7x per-core VMEM
    # Never ask for all of physical VMEM; leave room for compiler scratch.
    return min(int(cap * 0.8), 100 << 20)


def _pick_tile(dim, target):
    """Largest tile <= target that is the full dim or a multiple-of-8 divisor."""
    if dim <= target:
        return dim
    for t in range(target, 7, -1):
        if dim % t == 0 and t % 8 == 0:
            return t
    return dim


def _unique(seq):
    out = []
    for x in seq:
        if x not in out:
            out.append(x)
    return out


def _block_bytes(g, tq, tk, dk, dv, itemsize, with_attn):
    """Rough VMEM footprint of one grid step (double-buffered I/O + f32 temps)."""
    io = g * (tq * dk + tk * dk + tk * dv + tq * dv) * itemsize
    if with_attn:
        io += g * tq * tk * itemsize          # attention output block
    io *= 2                                    # double-buffered pipeline
    f32_tmp = g * tq * tk * 4 * (3 if with_attn else 2)   # s / p (/ attn)
    f32_tmp += g * tq * (dv + 4) * 4                       # pv + stats / scratch
    return io + f32_tmp


def _choose_tiles(bh, lq, lk, dk, dv, itemsize, with_attn, budget_bytes, max_g=64):
    """Coupled (TQ, TK, G) search: shrink tiles before accepting an over-budget G=1."""
    def fits(g, tq, tk):
        return _block_bytes(g, tq, tk, dk, dv, itemsize, with_attn) <= budget_bytes

    tk_cands = ([lk] if with_attn
                else _unique([_pick_tile(lk, t) for t in (2048, 1024, 512, 256, 128)]))
    tq_cands = _unique([_pick_tile(lq, t)
                        for t in (1024, 512, 256, 128, 64, 32, 16, 8)])

    for tk in tk_cands:
        for tq in tq_cands:
            if not fits(1, tq, tk):
                continue
            g = 1
            for cand in range(1, min(bh, max_g) + 1):
                if bh % cand == 0 and fits(cand, tq, tk):
                    g = cand
            return tq, tk, g
    # Best effort (may spill, still correct).
    return tq_cands[-1], tk_cands[-1], 1


# ---------------------------------------------------------------------------
# Wrapper
# ---------------------------------------------------------------------------

def scaled_dot_product_attention(q, k, v, temperature, *,
                                 return_attn=True,
                                 attn_dtype=None,
                                 use_bf16_mxu=False):
    """q: (B,H,Lq,Dk), k: (B,H,Lk,Dk), v: (B,H,Lk,Dv) -> (output, attn or None).

    return_attn=False is the fast path (no (BH,Lq,Lk) writeback, KV-tiled online
    softmax).  attn_dtype=jnp.bfloat16 halves the attention writeback when it is
    still needed.  use_bf16_mxu=True feeds bf16 operands to the MXU for f32
    inputs (f32 accumulation), trading a little accuracy for MXU throughput.
    """
    B, H, Lq, Dk = q.shape
    Lk = k.shape[2]
    Dv = v.shape[3]
    BH = B * H

    qf = q.reshape(BH, Lq, Dk)
    kf = k.reshape(BH, Lk, Dk)
    vf = v.reshape(BH, Lk, Dv)

    itemsize = q.dtype.itemsize
    vmem_limit = _vmem_limit_bytes()
    budget = vmem_limit // 2
    TQ, TK, G = _choose_tiles(BH, Lq, Lk, Dk, Dv, itemsize, return_attn, budget)

    inv_temperature = 1.0 / float(temperature)
    mxu_dtype = jnp.bfloat16 if (use_bf16_mxu and q.dtype == jnp.float32) else None
    a_dtype = q.dtype if attn_dtype is None else jnp.dtype(attn_dtype)

    flops = 2 * BH * Lq * Lk * (Dk + Dv)
    transcendentals = BH * Lq * Lk
    bytes_accessed = ((qf.size + kf.size + vf.size) * itemsize
                      + BH * Lq * Dv * itemsize
                      + (BH * Lq * Lk * a_dtype.itemsize if return_attn else 0))
    cost = pl.CostEstimate(flops=flops, transcendentals=transcendentals,
                           bytes_accessed=bytes_accessed)

    if return_attn:
        kernel = functools.partial(_sdpa_attn_kernel,
                                   inv_temperature=inv_temperature,
                                   mxu_dtype=mxu_dtype)
        out_f, attn_f = pl.pallas_call(
            kernel,
            out_shape=(jax.ShapeDtypeStruct((BH, Lq, Dv), q.dtype),
                       jax.ShapeDtypeStruct((BH, Lq, Lk), a_dtype)),
            grid_spec=pltpu.PrefetchScalarGridSpec(
                num_scalar_prefetch=0,
                grid=(BH // G, Lq // TQ),
                in_specs=[
                    pl.BlockSpec((G, TQ, Dk), lambda g, t: (g, t, 0)),
                    pl.BlockSpec((G, Lk, Dk), lambda g, t: (g, 0, 0)),
                    pl.BlockSpec((G, Lk, Dv), lambda g, t: (g, 0, 0)),
                ],
                out_specs=(
                    pl.BlockSpec((G, TQ, Dv), lambda g, t: (g, t, 0)),
                    pl.BlockSpec((G, TQ, Lk), lambda g, t: (g, t, 0)),
                ),
            ),
            compiler_params=pltpu.CompilerParams(
                dimension_semantics=("parallel", "parallel"),
                vmem_limit_bytes=vmem_limit,
            ),
            cost_estimate=cost,
        )(qf, kf, vf)
        return out_f.reshape(B, H, Lq, Dv), attn_f.reshape(B, H, Lq, Lk)

    kernel = functools.partial(_sdpa_flash_kernel,
                               inv_temperature=inv_temperature,
                               mxu_dtype=mxu_dtype)
    out_f = pl.pallas_call(
        kernel,
        out_shape=jax.ShapeDtypeStruct((BH, Lq, Dv), q.dtype),
        grid_spec=pltpu.PrefetchScalarGridSpec(
            num_scalar_prefetch=0,
            grid=(BH // G, Lq // TQ, Lk // TK),
            in_specs=[
                pl.BlockSpec((G, TQ, Dk), lambda g, t, s: (g, t, 0)),
                pl.BlockSpec((G, TK, Dk), lambda g, t, s: (g, s, 0)),
                pl.BlockSpec((G, TK, Dv), lambda g, t, s: (g, s, 0)),
            ],
            out_specs=pl.BlockSpec((G, TQ, Dv), lambda g, t, s: (g, t, 0)),
            scratch_shapes=[
                pltpu.VMEM((G, TQ, 1), jnp.float32),
                pltpu.VMEM((G, TQ, 1), jnp.float32),
                pltpu.VMEM((G, TQ, Dv), jnp.float32),
            ],
        ),
        compiler_params=pltpu.CompilerParams(
            dimension_semantics=("parallel", "parallel", "arbitrary"),
            vmem_limit_bytes=vmem_limit,
        ),
        cost_estimate=cost,
    )(qf, kf, vf)
    return out_f.reshape(B, H, Lq, Dv), None


# ---------------------------------------------------------------------------
# Reference + self-test
# ---------------------------------------------------------------------------

def _reference(q, k, v, temperature):
    s = jnp.einsum("bhqd,bhkd->bhqk", q / temperature, k)
    attn = jax.nn.softmax(s, axis=-1)
    out = jnp.einsum("bhqk,bhkd->bhqd", attn, v)
    return out, attn


if __name__ == "__main__":
    key = jax.random.PRNGKey(0)
    kq, kk, kv_ = jax.random.split(key, 3)

    B, H, L, D = 2, 4, 8, 32
    temperature = float(D) ** 0.5  # d_k ** 0.5 as used by PINAT

    q = jax.random.normal(kq, (B, H, L, D), dtype=jnp.float32)
    k = jax.random.normal(kk, (B, H, L, D), dtype=jnp.float32)
    v = jax.random.normal(kv_, (B, H, L, D), dtype=jnp.float32)

    ref_out, ref_attn = _reference(q, k, v, temperature)

    # Path 1: module-faithful forward (output, attn), exact softmax normalization.
    out, attn = scaled_dot_product_attention(q, k, v, temperature, return_attn=True)
    out = jax.block_until_ready(out)
    attn = jax.block_until_ready(attn)
    # Tolerances account for TPU default matmul precision differences vs einsum.
    assert jnp.allclose(out, ref_out, atol=2e-2, rtol=2e-2)
    assert jnp.allclose(attn, ref_attn, atol=2e-2, rtol=2e-2)

    # Path 2: fast path — KV-tiled online softmax, no attention writeback.
    out2, none_attn = scaled_dot_product_attention(q, k, v, temperature,
                                                   return_attn=False)
    out2 = jax.block_until_ready(out2)
    assert none_attn is None
    assert jnp.allclose(out2, ref_out, atol=2e-2, rtol=2e-2)

    # Path 3: bf16 MXU operands for f32 inputs (throughput option, looser check).
    out3, _ = scaled_dot_product_attention(q, k, v, temperature,
                                           return_attn=False, use_bf16_mxu=True)
    out3 = jax.block_until_ready(out3)
    assert jnp.allclose(out3, ref_out, atol=1e-1, rtol=1e-1)

    print("KERNEL_OK")
</pallas_src>

<mosaic_0001>
module attributes {stable_mosaic.version = 11 : i64} {
  func.func @_sdpa_attn_kernel(%arg0: i32, %arg1: i32, %arg2: memref<8x8x32xf32, #tpu.memory_space<vmem>>, %arg3: memref<8x8x32xf32, #tpu.memory_space<vmem>>, %arg4: memref<8x8x32xf32, #tpu.memory_space<vmem>>, %arg5: memref<8x8x32xf32, #tpu.memory_space<vmem>>, %arg6: memref<8x8x8xf32, #tpu.memory_space<vmem>>) attributes {dimension_semantics = [#tpu.dimension_semantics<parallel>, #tpu.dimension_semantics<parallel>], iteration_bounds = array<i64: 1, 1>, scalar_prefetch = 0 : i64, scratch_operands = 0 : i64, tpu.core_type = #tpu.core_type<tc>, window_params = [{transform_indices = @transform_0, window_bounds = array<i64: 8, 8, 32>}, {transform_indices = @transform_1, window_bounds = array<i64: 8, 8, 32>}, {transform_indices = @transform_2, window_bounds = array<i64: 8, 8, 32>}, {transform_indices = @transform_3, window_bounds = array<i64: 8, 8, 32>}, {transform_indices = @transform_4, window_bounds = array<i64: 8, 8, 8>}]} {
    %c0 = arith.constant 0 : index
    %c0_0 = arith.constant 0 : index
    %c0_1 = arith.constant 0 : index
    %0 = vector.load %arg2[%c0, %c0_0, %c0_1] : memref<8x8x32xf32, #tpu.memory_space<vmem>>, vector<8x8x32xf32>
    %cst = arith.constant 0.176776692 : f32
    %1 = vector.broadcast %cst : f32 to vector<8x8x32xf32>
    %2 = arith.mulf %0, %1 : vector<8x8x32xf32>
    %c0_2 = arith.constant 0 : index
    %c0_3 = arith.constant 0 : index
    %c0_4 = arith.constant 0 : index
    %3 = vector.load %arg3[%c0_2, %c0_3, %c0_4] : memref<8x8x32xf32, #tpu.memory_space<vmem>>, vector<8x8x32xf32>
    %c0_5 = arith.constant 0 : index
    %c0_6 = arith.constant 0 : index
    %c0_7 = arith.constant 0 : index
    %4 = vector.load %arg4[%c0_5, %c0_6, %c0_7] : memref<8x8x32xf32, #tpu.memory_space<vmem>>, vector<8x8x32xf32>
    %cst_8 = arith.constant dense<0.000000e+00> : vector<8x8x8xf32>
    %5 = tpu.matmul %2, %3, %cst_8 {dimension_numbers = #tpu.dot_dimension_numbers<[2], [2], [1], [1], [0, 0, 0, 1, 1, 1], [0], [0]>} : vector<8x8x32xf32>, vector<8x8x32xf32>, vector<8x8x8xf32> -> vector<8x8x8xf32>
    %cst_9 = arith.constant dense<0xFF800000> : vector<8x8xf32>
    %6 = vector.multi_reduction <maximumf>, %5, %cst_9 [2] : vector<8x8x8xf32> to vector<8x8xf32>
    %7 = vector.shape_cast %6 : vector<8x8xf32> to vector<8x8x1xf32>
    %8 = vector.broadcast %7 : vector<8x8x1xf32> to vector<8x8x8xf32>
    %9 = arith.subf %5, %8 : vector<8x8x8xf32>
    %10 = math.exp %9 : vector<8x8x8xf32>
    %cst_10 = arith.constant dense<0.000000e+00> : vector<8x8xf32>
    %11 = vector.multi_reduction <add>, %10, %cst_10 [2] : vector<8x8x8xf32> to vector<8x8xf32>
    %12 = vector.shape_cast %11 : vector<8x8xf32> to vector<8x8x1xf32>
    %cst_11 = arith.constant 1.000000e+00 : f32
    %13 = vector.broadcast %cst_11 : f32 to vector<8x8x1xf32>
    %14 = arith.divf %13, %12 : vector<8x8x1xf32>
    %cst_12 = arith.constant dense<0.000000e+00> : vector<8x8x32xf32>
    %15 = tpu.matmul %10, %4, %cst_12 {dimension_numbers = #tpu.dot_dimension_numbers<[2], [1], [1], [2], [0, 0, 0, 1, 1, 2], [0], [0]>} : vector<8x8x8xf32>, vector<8x8x32xf32>, vector<8x8x32xf32> -> vector<8x8x32xf32>
    %16 = vector.broadcast %14 : vector<8x8x1xf32> to vector<8x8x32xf32>
    %17 = arith.mulf %15, %16 : vector<8x8x32xf32>
    %c0_13 = arith.constant 0 : index
    %c0_14 = arith.constant 0 : index
    %c0_15 = arith.constant 0 : index
    %18 = vector.load %arg5[%c0_13, %c0_14, %c0_15] : memref<8x8x32xf32, #tpu.memory_space<vmem>>, vector<8x8x32xf32>
    tpu.vector_store %arg5[%c0_13, %c0_14, %c0_15], %17 {strides = array<i32>} : memref<8x8x32xf32, #tpu.memory_space<vmem>>, vector<8x8x32xf32>,
    %19 = vector.broadcast %14 : vector<8x8x1xf32> to vector<8x8x8xf32>
    %20 = arith.mulf %10, %19 : vector<8x8x8xf32>
    %c0_16 = arith.constant 0 : index
    %c0_17 = arith.constant 0 : index
    %c0_18 = arith.constant 0 : index
    %21 = vector.load %arg6[%c0_16, %c0_17, %c0_18] : memref<8x8x8xf32, #tpu.memory_space<vmem>>, vector<8x8x8xf32>
    tpu.vector_store %arg6[%c0_16, %c0_17, %c0_18], %20 {strides = array<i32>} : memref<8x8x8xf32, #tpu.memory_space<vmem>>, vector<8x8x8xf32>,
    return
  }
  func.func @transform_0(%arg0: i32, %arg1: i32) -> (i32, i32, i32) {
    %c0_i32 = arith.constant 0 : i32
    %c0_i32_0 = arith.constant 0 : i32
    return %arg0, %arg1, %c0_i32 : i32, i32, i32
  }
  func.func @transform_1(%arg0: i32, %arg1: i32) -> (i32, i32, i32) {
    %c0_i32 = arith.constant 0 : i32
    %c0_i32_0 = arith.constant 0 : i32
    %c0_i32_1 = arith.constant 0 : i32
    return %arg0, %c0_i32, %c0_i32_0 : i32, i32, i32
  }
  func.func @transform_2(%arg0: i32, %arg1: i32) -> (i32, i32, i32) {
    %c0_i32 = arith.constant 0 : i32
    %c0_i32_0 = arith.constant 0 : i32
    %c0_i32_1 = arith.constant 0 : i32
    return %arg0, %c0_i32, %c0_i32_0 : i32, i32, i32
  }
  func.func @transform_3(%arg0: i32, %arg1: i32) -> (i32, i32, i32) {
    %c0_i32 = arith.constant 0 : i32
    %c0_i32_0 = arith.constant 0 : i32
    return %arg0, %arg1, %c0_i32 : i32, i32, i32
  }
  func.func @transform_4(%arg0: i32, %arg1: i32) -> (i32, i32, i32) {
    %c0_i32 = arith.constant 0 : i32
    %c0_i32_0 = arith.constant 0 : i32
    return %arg0, %arg1, %c0_i32 : i32, i32, i32
  }
}

</mosaic_0001>

<bundles_post_ra>
// kernel: tpu_custom_call.1
= control target key start
LH: loop header
LB: loop body
LE: loop exit
PB: predicated region body
PF: predicated region fallthrough
CT: control target
= control target key end

     0   :  { %10 = vsyncpa [#allocation3], 0  ;;  %s1969_s0 = inlined_call_operand.hbm [shape: f32[8,8,32], index: 0, kind: input, shape index: {}]   ;;  %s1970_s1 = inlined_call_operand.hbm [shape: f32[8,8,32], index: 1, kind: input, shape index: {}]   ;;  %s1971_s2 = inlined_call_operand.hbm [shape: f32[8,8,32], index: 2, kind: input, shape index: {}]   ;;  %s1972_s3 = inlined_call_operand.hbm [shape: f32[8,8,32], index: 3, kind: output, shape index: {0}]   ;;  %s1973_s4 = inlined_call_operand.hbm [shape: f32[8,8,8], index: 4, kind: output, shape index: {1}]  }
   0x1   :  { %11 = vsyncpa [#allocation6], 0 }
   0x2   :  { %12 = vsyncpa [#allocation4], 0 }
   0x3   :  { %13 = vsyncpa [#allocation10], 0  ;;  %s1734_s15 = smov [#allocation5]   ;;  %s1735_s17 = smov [#allocation2]  }
   0x4   :  { %s31_s16 = sshll.u32 %s1734_s15, 4  ;;  %s19_s18 = sshll.u32 %s1735_s17, 4  ;;  %s32_s16 = int_to_ptr.vmem [resolvable:$true] %s31_s16  ;;  %s1768_s18 = int_to_ptr.vmem [resolvable:$true] %s19_s18 }
   0x5   :  { %s1616_s21 = scalar_lea.hbm %s1970_s1, 1024 }
   0x6   :  { %p1617_p0 = scmp.ne.s32.totalorder %s1970_s1, %s1616_s21  ;;  %p1620_p1 = scmp.lt.u32.totalorder %s1616_s21, %s1970_s1 }
   0x8   :  { %p1622_p2 = pnand %p1620_p1, %p1617_p0 }
   0xa   :  { %1625 = shalt.err (!%p1622_p2)
}
   0xb   :  { %s1626_s26 = scalar_lea.vmem %s32_s16, 1024  ;;  %p1631_p4 = scmp.lt.s32.totalorder %s32_s16, %s32_s16 }
   0xc   :  { %p1627_p3 = scmp.ne.s32.totalorder %s32_s16, %s1626_s26  ;;  %p1632_p5 = scmp.lt.s32.totalorder %s1626_s26, %s1626_s26 }
   0xe   :  { %p1633_p6 = por %p1632_p5, %p1631_p4 }
  0x10   :  { %p1634_p7 = pnand %p1633_p6, %p1627_p3 }
  0x12   :  { %1637 = shalt.err (!%p1634_p7)
}
  0x13   :  { %s1736_s27 = smov 128   ;;  %s1737_s28 = smov 8  }
  0x14   :  { %37 = dma.hbm_to_vmem [thread:$0]  %s1970_s1, 1024, %s32_s16, [#allocation6], %s1736_s27, %s1736_s27, %s1737_s28  }
  0x15   :  { %s1638_s7 = scalar_lea.hbm %s1969_s0, 1024 }
  0x16   :  { %p1639_p8 = scmp.ne.s32.totalorder %s1969_s0, %s1638_s7  ;;  %p1642_p9 = scmp.lt.u32.totalorder %s1638_s7, %s1969_s0 }
  0x18   :  { %p1644_p10 = pnand %p1642_p9, %p1639_p8 }
  0x1a   :  { %1647 = shalt.err (!%p1644_p10)
}
  0x1b   :  { %s1648_s12 = scalar_lea.vmem %s1768_s18, 1024  ;;  %p1653_p12 = scmp.lt.s32.totalorder %s1768_s18, %s1768_s18 }
  0x1c   :  { %p1649_p11 = scmp.ne.s32.totalorder %s1768_s18, %s1648_s12  ;;  %p1654_p13 = scmp.lt.s32.totalorder %s1648_s12, %s1648_s12 }
  0x1e   :  { %p1655_p0 = por %p1654_p13, %p1653_p12 }
  0x20   :  { %p1656_p1 = pnand %p1655_p0, %p1649_p11 }
  0x22   :  { %1659 = shalt.err (!%p1656_p1)
}
  0x23   :  { %25 = dma.hbm_to_vmem [thread:$0]  %s1969_s0, 1024, %s1768_s18, [#allocation3], %s1736_s27, %s1736_s27, %s1737_s28  }
  0x24   :  { %s1738_s14 = smov [#allocation7]   ;;  %s1660_s19 = scalar_lea.hbm %s1971_s2, 1024 }
  0x25   :  { %s43_s15 = sshll.u32 %s1738_s14, 4  ;;  %p1661_p2 = scmp.ne.s32.totalorder %s1971_s2, %s1660_s19  ;;  %s44_s15 = int_to_ptr.vmem [resolvable:$true] %s43_s15 }
  0x26   :  { %p1664_p3 = scmp.lt.u32.totalorder %s1660_s19, %s1971_s2 }
  0x28   :  { %p1666_p4 = pnand %p1664_p3, %p1661_p2 }
  0x2a   :  { %1669 = shalt.err (!%p1666_p4)
}
  0x2b   :  { %s1670_s24 = scalar_lea.vmem %s44_s15, 1024  ;;  %p1675_p6 = scmp.lt.s32.totalorder %s44_s15, %s44_s15 }
  0x2c   :  { %p1671_p5 = scmp.ne.s32.totalorder %s44_s15, %s1670_s24  ;;  %p1676_p7 = scmp.lt.s32.totalorder %s1670_s24, %s1670_s24 }
  0x2e   :  { %p1677_p8 = por %p1676_p7, %p1675_p6 }
  0x30   :  { %p1678_p9 = pnand %p1677_p8, %p1671_p5 }
  0x32   :  { %1681 = shalt.err (!%p1678_p9)
}
  0x33   :  { %49 = dma.hbm_to_vmem [thread:$0]  %s1971_s2, 1024, %s44_s15, [#allocation6], %s1736_s27, %s1736_s27, %s1737_s28  }
  0x34   :  { %1726 = dma.done.wait [#allocation3], 1024  }
  0x35   :  { %1727 = vsyncadd [#allocation3], 4294966272 }
  0x36   :  { %1728 = dma.done.wait [#allocation6], 2048  }
  0x37   :  { %1729 = vsyncadd [#allocation6], 4294965248  ;;  %v1739_v0 = vmov 0.0   ;;  %vm1740_vm0 = vmmov 0   ;;  %vm91_vm1 = vcmask 261120   ;;  %v75_v1 = vld [vmem:[#allocation5] sm:$0xff] }
  0x38   :  { %1495 = vmatprep.subr.mxu0 %v1739_v0  ;;  %1497 = vmatprep.mubr.msk.f32.mxu0 %vm1740_vm0, %v1739_v0  ;;  %v59_v2 = vld [vmem:[#allocation2] sm:$0xff]  ;;  %v76_v3 = vld [vmem:[#allocation5 + $0x8] sm:$0xff]  ;;  %v61_v6 = vld [vmem:[#allocation2 + $0x10] sm:$0xff]  ;;  %vm700_vm2 = vcmask 64512   ;;  %s1741_s2 = smov [#allocation9]  }
  0x39   :  { %1500 = vmatprep.subr.mxu1 %v1739_v0  ;;  %1502 = vmatprep.mubr.msk.f32.mxu1 %vm1740_vm0, %v1739_v0  ;;  %v67_v4 = vmul.f32 0.17677669, %v59_v2  ;;  %v60_v5 = vld [vmem:[#allocation2 + $0x8] sm:$0xff]  ;;  %v77_v7 = vld [vmem:[#allocation5 + $0x10] sm:$0xff]  ;;  %v78_v9 = vld [vmem:[#allocation5 + $0x18] sm:$0xff]  ;;  %s1422_s25 = sshll.u32 %s1741_s2, 4  ;;  %s1423_s25 = int_to_ptr.vmem [resolvable:$true] %s1422_s25 }
  0x3a   :  { %1496 = vmatpush3.xpose.msk.msra.mxu0 %vm91_vm1, %v75_v1  ;;  %1501 = vmatpush3.xpose.msk.msra.mxu1 %vm91_vm1, %v76_v3  ;;  %v68_v8 = vmul.f32 0.17677669, %v60_v5  ;;  %v62_v10 = vld [vmem:[#allocation2 + $0x18] sm:$0xff]  ;;  %v69_v11 = vmul.f32 0.17677669, %v61_v6  ;;  %v63_v12 = vld [vmem:[#allocation2 + $0x20] sm:$0xff]  ;;  %p1687_p11 = scmp.lt.s32.totalorder %s1423_s25, %s1423_s25 }
  0x3b   :  { %1505 = vmatprep.subr.mxu0 %v1739_v0  ;;  %1510 = vmatprep.subr.mxu1 %v1739_v0  ;;  %v79_v13 = vld [vmem:[#allocation5 + $0x20] sm:$0xff]  ;;  %v70_v14 = vmul.f32 0.17677669, %v62_v10  ;;  %v64_v15 = vld [vmem:[#allocation2 + $0x28] sm:$0xff]  ;;  %v71_v16 = vmul.f32 0.17677669, %v63_v12 }
  0x3c   :  { %v80_v17 = vld [vmem:[#allocation5 + $0x28] sm:$0xff]  ;;  %v65_v18 = vld [vmem:[#allocation2 + $0x30] sm:$0xff]  ;;  %v72_v20 = vmul.f32 0.17677669, %v64_v15  ;;  %v66_v21 = vld [vmem:[#allocation2 + $0x38] sm:$0xff]  ;;  %s1682_s26 = scalar_lea.vmem %s1423_s25, 1024 }
  0x3d   :  { %1498 = vmatmul.mubr.msk.f32.vlgmr.msra.gmra.mrb[0].mxu0 %vm91_vm1, %v67_v4  ;;  %1503 = vmatmul.mubr.msk.f32.vlgmr.msra.gmra.mrb[0].mxu1 %vm91_vm1, %v68_v8  ;;  %v81_v19 = vld [vmem:[#allocation5 + $0x30] sm:$0xff]  ;;  %v73_v22 = vmul.f32 0.17677669, %v65_v18  ;;  %v82_v23 = vld [vmem:[#allocation5 + $0x38] sm:$0xff]  ;;  %v74_v24 = vmul.f32 0.17677669, %v66_v21  ;;  %p1683_p10 = scmp.ne.s32.totalorder %s1423_s25, %s1682_s26  ;;  %p1688_p12 = scmp.lt.s32.totalorder %s1682_s26, %s1682_s26 }
  0x3e   :  { %1506 = vmatpush3.xpose.msk.msra.mxu0 %vm91_vm1, %v77_v7  ;;  %1507 = vmatprep.mubr.msk.f32.mxu0 %vm1740_vm0, %v1739_v0  ;;  %v83_v49 = vld [vmem:[#allocation7] sm:$0xff]  ;;  %v84_v50 = vld [vmem:[#allocation7 + $0x8] sm:$0xff]  ;;  %v85_v7 = vld [vmem:[#allocation7 + $0x10] sm:$0xff] }
  0x3f   :  { %1515 = vmatprep.subr.mxu0 %v1739_v0  ;;  %1511 = vmatpush3.xpose.msk.msra.mxu1 %vm91_vm1, %v78_v9  ;;  %p1689_p13 = por %p1688_p12, %p1687_p11 }
  0x40   :  { %1512 = vmatprep.mubr.msk.f32.mxu1 %vm1740_vm0, %v1739_v0  ;;  %1520 = vmatprep.subr.mxu1 %v1739_v0 }
  0x41   :  { %1508 = vmatmul.mubr.msk.f32.vlgmr.msra.gmra.mrb[2].mxu0 %vm91_vm1, %v69_v11  ;;  %p1690_p0 = pnand %p1689_p13, %p1683_p10 }
  0x42   :  { %1516 = vmatpush3.xpose.msk.msra.mxu0 %vm91_vm1, %v79_v13  ;;  %1517 = vmatprep.mubr.msk.f32.mxu0 %vm1740_vm0, %v1739_v0 }
  0x43   :  { %1513 = vmatmul.mubr.msk.f32.vlgmr.msra.gmra.mrb[2].mxu1 %vm91_vm1, %v70_v14  ;;  %1525 = vmatprep.subr.mxu0 %v1739_v0  ;;  %v86_v14 = vld [vmem:[#allocation7 + $0x18] sm:$0xff] }
  0x44   :  { %1521 = vmatpush3.xpose.msk.msra.mxu1 %vm91_vm1, %v80_v17  ;;  %1522 = vmatprep.mubr.msk.f32.mxu1 %vm1740_vm0, %v1739_v0 }
  0x45   :  { %1518 = vmatmul.mubr.msk.f32.vlgmr.msra.gmra.mrb[4].mxu0 %vm91_vm1, %v71_v16  ;;  %1530 = vmatprep.subr.mxu1 %v1739_v0 }
  0x46   :  { %1526 = vmatpush3.xpose.msk.msra.mxu0 %vm91_vm1, %v81_v19  ;;  %1527 = vmatprep.mubr.msk.f32.mxu0 %vm1740_vm0, %v1739_v0  ;;  %v87_v19 = vld [vmem:[#allocation7 + $0x20] sm:$0xff] }
  0x47   :  { %1523 = vmatmul.mubr.msk.f32.vlgmr.msra.gmra.mrb[4].mxu1 %vm91_vm1, %v72_v20  ;;  %1535 = vmatprep.subr.mxu0 %v1739_v0 }
  0x48   :  { %1531 = vmatpush3.xpose.msk.msra.mxu1 %vm91_vm1, %v82_v23  ;;  %1532 = vmatprep.mubr.msk.f32.mxu1 %vm1740_vm0, %v1739_v0 }
  0x49   :  { %1528 = vmatmul.mubr.msk.f32.vlgmr.msra.gmra.mrb[6].mxu0 %vm91_vm1, %v73_v22  ;;  %1540 = vmatprep.subr.mxu1 %v1739_v0  ;;  %v88_v22 = vld [vmem:[#allocation7 + $0x28] sm:$0xff] }
  0x4a   :  { %1537 = vmatprep.mubr.msk.f32.mxu0 %vm1740_vm0, %v1739_v0  ;;  %1536 = vmatpush3.msra.mxu0 %v83_v49 }
  0x4b   :  { %1533 = vmatmul.mubr.msk.f32.vlgmr.msra.gmra.mrb[6].mxu1 %vm91_vm1, %v74_v24  ;;  %1545 = vmatprep.subr.mxu0 %v1739_v0 }
  0x4c   :  { %1542 = vmatprep.mubr.msk.f32.mxu1 %vm1740_vm0, %v1739_v0  ;;  %1541 = vmatpush3.msra.mxu1 %v84_v50 }
  0x4d   :  { %1550 = vmatprep.subr.mxu1 %v1739_v0 }
 0x110   :  { %v164_v25 = vpop.f32.mrb[0].mxu0  ;;  %v240_v26 = vpop.f32.mrb[0].mxu1 }
 0x111   :  { %v1499_v27 = vpop.f32.mrb[1].mxu0  ;;  %v701_v28 = vsel %vm700_vm2, %v164_v25, -inf  ;;  %v1504_v29 = vpop.f32.mrb[1].mxu1  ;;  %v704_v30 = vsel %vm700_vm2, %v240_v26, -inf }
 0x112   :  { %702 = vmax.xlane.f32.xlu0 %v701_v28  ;;  %v90_v29 = vld [vmem:[#allocation7 + $0x38] sm:$0xff] }
 0x114   :  { %v316_v31 = vpop.f32.mrb[2].mxu0 }
 0x115   :  { %v1509_v32 = vpop.f32.mrb[3].mxu0  ;;  %v707_v33 = vsel %vm700_vm2, %v316_v31, -inf }
 0x116   :  { %705 = vmax.xlane.f32.xlu0 %v704_v30  ;;  %708 = vmax.xlane.f32.xlu1 %v707_v33  ;;  %v392_v34 = vpop.f32.mrb[2].mxu1 }
 0x117   :  { %v1514_v35 = vpop.f32.mrb[3].mxu1  ;;  %v710_v36 = vsel %vm700_vm2, %v392_v34, -inf }
 0x118   :  { %v468_v37 = vpop.f32.mrb[4].mxu0 }
 0x119   :  { %v713_v38 = vsel %vm700_vm2, %v468_v37, -inf  ;;  %v1519_v39 = vpop.f32.mrb[5].mxu0 }
 0x11a   :  { %711 = vmax.xlane.f32.xlu1 %v710_v36  ;;  %714 = vmax.xlane.f32.xlu0 %v713_v38  ;;  %v544_v40 = vpop.f32.mrb[4].mxu1 }
 0x11b   :  { %v1524_v41 = vpop.f32.mrb[5].mxu1  ;;  %v716_v42 = vsel %vm700_vm2, %v544_v40, -inf }
 0x11c   :  { %v620_v43 = vpop.f32.mrb[6].mxu0 }
 0x11d   :  { %v719_v44 = vsel %vm700_vm2, %v620_v43, -inf  ;;  %v1529_v45 = vpop.f32.mrb[7].mxu0 }
 0x11e   :  { %717 = vmax.xlane.f32.xlu1 %v716_v42  ;;  %720 = vmax.xlane.f32.xlu0 %v719_v44  ;;  %v696_v46 = vpop.f32.mrb[6].mxu1 }
 0x11f   :  { %v1534_v47 = vpop.f32.mrb[7].mxu1  ;;  %v722_v48 = vsel %vm700_vm2, %v696_v46, -inf }
 0x122   :  { %723 = vmax.xlane.f32.xlu1 %v722_v48 }
 0x19f   :  { %v703_v51 = vpop.xlane.xlu0 %702 }
 0x1a0   :  { %v725_v52 = vsub.f32 %v164_v25, %v703_v51 }
 0x1a2   :  { %v733_v53 = vmul.f32 1.442695, %v725_v52 }
 0x1a3   :  { %v706_v54 = vpop.xlane.xlu0 %705  ;;  %v709_v55 = vpop.xlane.xlu1 %708 }
 0x1a4   :  { %1584 = vpow2.f32 %v733_v53  ;;  %v726_v56 = vsub.f32 %v240_v26, %v706_v54  ;;  %v727_v57 = vsub.f32 %v316_v31, %v709_v55  ;;  %v89_v26 = vld [vmem:[#allocation7 + $0x30] sm:$0xff] }
 0x1a6   :  { %v735_v58 = vmul.f32 1.442695, %v726_v56  ;;  %v737_v59 = vmul.f32 1.442695, %v727_v57 }
 0x1a7   :  { %v712_v60 = vpop.xlane.xlu1 %711  ;;  %v715_v61 = vpop.xlane.xlu0 %714 }
 0x1a8   :  { %1586 = vpow2.f32 %v735_v58  ;;  %v728_v62 = vsub.f32 %v392_v34, %v712_v60  ;;  %v729_v63 = vsub.f32 %v468_v37, %v715_v61 }
 0x1a9   :  { %1588 = vpow2.f32 %v737_v59 }
 0x1aa   :  { %v739_v1 = vmul.f32 1.442695, %v728_v62  ;;  %v741_v2 = vmul.f32 1.442695, %v729_v63 }
 0x1ab   :  { %v718_v3 = vpop.xlane.xlu1 %717  ;;  %v721_v4 = vpop.xlane.xlu0 %720 }
 0x1ac   :  { %1590 = vpow2.f32 %v739_v1  ;;  %v730_v5 = vsub.f32 %v544_v40, %v718_v3  ;;  %v731_v6 = vsub.f32 %v620_v43, %v721_v4 }
 0x1ad   :  { %1592 = vpow2.f32 %v741_v2 }
 0x1ae   :  { %v1876_v8 = vpop.eup %1584  ;;  %v743_v9 = vmul.f32 1.442695, %v730_v5  ;;  %v745_v10 = vmul.f32 1.442695, %v731_v6 }
 0x1af   :  { %1538 = vmatmul.mubr.msk.f32.vlgmr.msra.gmra.mrb[8].mxu0 %vm700_vm2, %v1876_v8  ;;  %v724_v11 = vpop.xlane.xlu1 %723  ;;  %v749_v12 = vsel %vm700_vm2, %v1876_v8, 0.0 }
 0x1b0   :  { %1594 = vpow2.f32 %v743_v9  ;;  %v732_v13 = vsub.f32 %v696_v46, %v724_v11  ;;  %750 = vadd.xlane.f32.xlu0 %v749_v12  ;;  %1546 = vmatpush3.msra.mxu0 %v85_v7 }
 0x1b1   :  { %1596 = vpow2.f32 %v745_v10  ;;  %1547 = vmatprep.mubr.msk.f32.mxu0 %vm1740_vm0, %v1739_v0  ;;  %1555 = vmatprep.subr.mxu0 %v1739_v0 }
 0x1b2   :  { %v1885_v15 = vpop.eup %1586  ;;  %v747_v16 = vmul.f32 1.442695, %v732_v13 }
 0x1b3   :  { %v1887_v17 = vpop.eup %1588  ;;  %1543 = vmatmul.mubr.msk.f32.vlgmr.msra.gmra.mrb[8].mxu1 %vm700_vm2, %v1885_v15  ;;  %v752_v18 = vsel %vm700_vm2, %v1885_v15, 0.0 }
 0x1b4   :  { %1598 = vpow2.f32 %v747_v16  ;;  %1548 = vmatmul.mubr.msk.f32.vlgmr.msra.gmra.mrb[10].mxu0 %vm700_vm2, %v1887_v17  ;;  %1551 = vmatpush3.msra.mxu1 %v86_v14  ;;  %v755_v20 = vsel %vm700_vm2, %v1887_v17, 0.0 }
 0x1b5   :  { %753 = vadd.xlane.f32.xlu1 %v752_v18  ;;  %756 = vadd.xlane.f32.xlu0 %v755_v20 }
 0x1b6   :  { %v1591_v21 = vpop.eup %1590  ;;  %1552 = vmatprep.mubr.msk.f32.mxu1 %vm1740_vm0, %v1739_v0  ;;  %1556 = vmatpush3.msra.mxu0 %v87_v19 }
 0x1b7   :  { %v1593_v23 = vpop.eup %1592  ;;  %1557 = vmatprep.mubr.msk.f32.mxu0 %vm1740_vm0, %v1739_v0  ;;  %1553 = vmatmul.mubr.msk.f32.vlgmr.msra.gmra.mrb[10].mxu1 %vm700_vm2, %v1591_v21  ;;  %v758_v24 = vsel %vm700_vm2, %v1591_v21, 0.0 }
 0x1b8   :  { %1558 = vmatmul.mubr.msk.f32.vlgmr.msra.gmra.mrb[12].mxu0 %vm700_vm2, %v1593_v23  ;;  %1560 = vmatprep.subr.mxu1 %v1739_v0  ;;  %v761_v25 = vsel %vm700_vm2, %v1593_v23, 0.0 }
 0x1b9   :  { %1561 = vmatpush3.msra.mxu1 %v88_v22  ;;  %759 = vadd.xlane.f32.xlu1 %v758_v24 }
 0x1ba   :  { %v1595_v27 = vpop.eup %1594  ;;  %762 = vadd.xlane.f32.xlu0 %v761_v25  ;;  %1565 = vmatprep.subr.mxu0 %v1739_v0 }
 0x1bb   :  { %v1597_v28 = vpop.eup %1596  ;;  %1562 = vmatprep.mubr.msk.f32.mxu1 %vm1740_vm0, %v1739_v0  ;;  %1566 = vmatpush3.msra.mxu0 %v89_v26  ;;  %v764_v30 = vsel %vm700_vm2, %v1595_v27, 0.0 }
 0x1bc   :  { %1567 = vmatprep.mubr.msk.f32.mxu0 %vm1740_vm0, %v1739_v0  ;;  %1563 = vmatmul.mubr.msk.f32.vlgmr.msra.gmra.mrb[12].mxu1 %vm700_vm2, %v1595_v27  ;;  %v767_v31 = vsel %vm700_vm2, %v1597_v28, 0.0 }
 0x1bd   :  { %1568 = vmatmul.mubr.msk.f32.vlgmr.msra.gmra.mrb[14].mxu0 %vm700_vm2, %v1597_v28  ;;  %1570 = vmatprep.subr.mxu1 %v1739_v0 }
 0x1be   :  { %v1599_v32 = vpop.eup %1598  ;;  %1571 = vmatpush3.msra.mxu1 %v90_v29  ;;  %765 = vadd.xlane.f32.xlu1 %v764_v30 }
 0x1bf   :  { %768 = vadd.xlane.f32.xlu0 %v767_v31  ;;  %1572 = vmatprep.mubr.msk.f32.mxu1 %vm1740_vm0, %v1739_v0  ;;  %v770_v33 = vsel %vm700_vm2, %v1599_v32, 0.0 }
 0x1c0   :  { %1573 = vmatmul.mubr.msk.f32.vlgmr.msra.gmra.mrb[14].mxu1 %vm700_vm2, %v1599_v32 }
 0x1c2   :  { %771 = vadd.xlane.f32.xlu1 %v770_v33 }
 0x23d   :  { %v751_v34 = vpop.xlane.xlu0 %750 }
 0x23e   :  { %1600 = vrcp.f32 %v751_v34 }
 0x242   :  { %v754_v35 = vpop.xlane.xlu1 %753  ;;  %v757_v36 = vpop.xlane.xlu0 %756 }
 0x243   :  { %1602 = vrcp.f32 %v754_v35 }
 0x244   :  { %1604 = vrcp.f32 %v757_v36 }
 0x246   :  { %v760_v37 = vpop.xlane.xlu1 %759 }
 0x247   :  { %1606 = vrcp.f32 %v760_v37  ;;  %v763_v38 = vpop.xlane.xlu0 %762 }
 0x248   :  { %v1601_v39 = vpop.eup %1600  ;;  %1608 = vrcp.f32 %v763_v38 }
 0x249   :  { %v1389_v40 = vmul.f32 %v1601_v39, %v1876_v8 }
 0x24b   :  { %1397 = vst.msk [vmem:[#allocation9] sm:$0xff] %vm700_vm2, %v1389_v40  ;;  %v766_v0 = vpop.xlane.xlu1 %765 }
 0x24c   :  { %1610 = vrcp.f32 %v766_v0  ;;  %v769_v41 = vpop.xlane.xlu0 %768 }
 0x24d   :  { %v1603_v42 = vpop.eup %1602  ;;  %1612 = vrcp.f32 %v769_v41 }
 0x24e   :  { %v1605_v43 = vpop.eup %1604  ;;  %v1390_v44 = vmul.f32 %v1603_v42, %v1885_v15 }
 0x24f   :  { %v1391_v45 = vmul.f32 %v1605_v43, %v1887_v17  ;;  %v772_v46 = vpop.xlane.xlu1 %771 }
 0x250   :  { %1398 = vst.msk [vmem:[#allocation9 + $0x8] sm:$0xff] %vm700_vm2, %v1390_v44  ;;  %1614 = vrcp.f32 %v772_v46 }
 0x251   :  { %v1607_v47 = vpop.eup %1606  ;;  %1399 = vst.msk [vmem:[#allocation9 + $0x10] sm:$0xff] %vm700_vm2, %v1391_v45 }
 0x252   :  { %v1609_v48 = vpop.eup %1608  ;;  %v1392_v49 = vmul.f32 %v1607_v47, %v1591_v21 }
 0x253   :  { %v1393_v50 = vmul.f32 %v1609_v48, %v1593_v23 }
 0x254   :  { %1400 = vst.msk [vmem:[#allocation9 + $0x18] sm:$0xff] %vm700_vm2, %v1392_v49 }
 0x255   :  { %1401 = vst.msk [vmem:[#allocation9 + $0x20] sm:$0xff] %vm700_vm2, %v1393_v50 }
 0x256   :  { %v1611_v51 = vpop.eup %1610 }
 0x257   :  { %v1613_v52 = vpop.eup %1612  ;;  %v1394_v53 = vmul.f32 %v1611_v51, %v1595_v27 }
 0x258   :  { %v1395_v54 = vmul.f32 %v1613_v52, %v1597_v28 }
 0x259   :  { %1402 = vst.msk [vmem:[#allocation9 + $0x28] sm:$0xff] %vm700_vm2, %v1394_v53 }
 0x25a   :  { %v1615_v55 = vpop.eup %1614  ;;  %1403 = vst.msk [vmem:[#allocation9 + $0x30] sm:$0xff] %vm700_vm2, %v1395_v54 }
 0x25b   :  { %v1396_v56 = vmul.f32 %v1615_v55, %v1599_v32 }
 0x25d   :  { %1404 = vst.msk [vmem:[#allocation9 + $0x38] sm:$0xff] %vm700_vm2, %v1396_v56 }
 0x25e   :  { %1693 = shalt.err (!%p1690_p0)
}
 0x25f   :  { %s1694_s5 = scalar_lea.hbm %s1973_s4, 1024 }
 0x260   :  { %p1695_p1 = scmp.ne.s32.totalorder %s1973_s4, %s1694_s5  ;;  %p1698_p2 = scmp.lt.u32.totalorder %s1694_s5, %s1973_s4 }
 0x262   :  { %p1700_p3 = pnand %p1698_p2, %p1695_p1 }
 0x264   :  { %1703 = shalt.err (!%p1700_p3)
}
 0x265   :  { %1428 = dma.vmem_to_hbm [thread:$0]  %s1423_s25, 1024, %s1973_s4, [#allocation10], %s1736_s27, %s1736_s27, %s1737_s28  }
 0x266   :  { %s1742_s4 = smov [#allocation8]  }
 0x267   :  { %s1410_s12 = sshll.u32 %s1742_s4, 4  ;;  %s1411_s12 = int_to_ptr.vmem [resolvable:$true] %s1410_s12 }
 0x268   :  { %s1704_s1 = scalar_lea.vmem %s1411_s12, 1024  ;;  %p1709_p5 = scmp.lt.s32.totalorder %s1411_s12, %s1411_s12 }
 0x269   :  { %p1705_p4 = scmp.ne.s32.totalorder %s1411_s12, %s1704_s1  ;;  %p1710_p6 = scmp.lt.s32.totalorder %s1704_s1, %s1704_s1 }
 0x26b   :  { %p1711_p7 = por %p1710_p6, %p1709_p5 }
 0x26d   :  { %p1712_p8 = pnand %p1711_p7, %p1705_p4 }
 0x282   :  { %v858_v57 = vpop.f32.mrb[8].mxu0 }
 0x283   :  { %v1373_v58 = vmul.f32 %v1601_v39, %v858_v57  ;;  %v1539_v59 = vpop.f32.mrb[9].mxu0 }
 0x285   :  { %1381 = vst.msk [vmem:[#allocation8] sm:$0xff] %vm91_vm1, %v1373_v58 }
 0x286   :  { %v931_v60 = vpop.f32.mrb[8].mxu1 }
 0x287   :  { %v1374_v61 = vmul.f32 %v1603_v42, %v931_v60  ;;  %v1004_v62 = vpop.f32.mrb[10].mxu0  ;;  %v1544_v63 = vpop.f32.mrb[9].mxu1 }
 0x288   :  { %v1375_v1 = vmul.f32 %v1605_v43, %v1004_v62  ;;  %v1549_v2 = vpop.f32.mrb[11].mxu0 }
 0x289   :  { %1382 = vst.msk [vmem:[#allocation8 + $0x8] sm:$0xff] %vm91_vm1, %v1374_v61 }
 0x28a   :  { %1383 = vst.msk [vmem:[#allocation8 + $0x10] sm:$0xff] %vm91_vm1, %v1375_v1  ;;  %v1077_v3 = vpop.f32.mrb[10].mxu1 }
 0x28b   :  { %v1376_v4 = vmul.f32 %v1607_v47, %v1077_v3  ;;  %v1150_v5 = vpop.f32.mrb[12].mxu0  ;;  %v1554_v6 = vpop.f32.mrb[11].mxu1 }
 0x28c   :  { %v1377_v7 = vmul.f32 %v1609_v48, %v1150_v5  ;;  %v1559_v8 = vpop.f32.mrb[13].mxu0 }
 0x28d   :  { %1384 = vst.msk [vmem:[#allocation8 + $0x18] sm:$0xff] %vm91_vm1, %v1376_v4 }
 0x28e   :  { %1385 = vst.msk [vmem:[#allocation8 + $0x20] sm:$0xff] %vm91_vm1, %v1377_v7 }
 0x28f   :  { %v1223_v9 = vpop.f32.mrb[12].mxu1 }
 0x290   :  { %v1378_v10 = vmul.f32 %v1611_v51, %v1223_v9  ;;  %v1296_v11 = vpop.f32.mrb[14].mxu0  ;;  %v1564_v12 = vpop.f32.mrb[13].mxu1 }
 0x291   :  { %v1379_v13 = vmul.f32 %v1613_v52, %v1296_v11  ;;  %v1569_v14 = vpop.f32.mrb[15].mxu0 }
 0x292   :  { %1386 = vst.msk [vmem:[#allocation8 + $0x28] sm:$0xff] %vm91_vm1, %v1378_v10 }
 0x293   :  { %1387 = vst.msk [vmem:[#allocation8 + $0x30] sm:$0xff] %vm91_vm1, %v1379_v13  ;;  %v1369_v15 = vpop.f32.mrb[14].mxu1 }
 0x294   :  { %v1380_v16 = vmul.f32 %v1615_v55, %v1369_v15  ;;  %v1574_v17 = vpop.f32.mrb[15].mxu1 }
 0x296   :  { %1388 = vst.msk [vmem:[#allocation8 + $0x38] sm:$0xff] %vm91_vm1, %v1380_v16 }
 0x297   :  { %1715 = shalt.err (!%p1712_p8)
}
 0x298   :  { %s1716_s15 = scalar_lea.hbm %s1972_s3, 1024 }
 0x299   :  { %p1717_p9 = scmp.ne.s32.totalorder %s1972_s3, %s1716_s15  ;;  %p1720_p10 = scmp.lt.u32.totalorder %s1716_s15, %s1972_s3 }
 0x29b   :  { %p1722_p11 = pnand %p1720_p10, %p1717_p9 }
 0x29d   :  { %1725 = shalt.err (!%p1722_p11)
}
 0x29e   :  { %1416 = dma.vmem_to_hbm [thread:$0]  %s1411_s12, 1024, %s1972_s3, [#allocation4], %s1736_s27, %s1736_s27, %s1737_s28  }
 0x29f   :  { %1730 = dma.done.wait [#allocation4], 1024  }
 0x2a0   :  { %1731 = vsyncadd [#allocation4], 4294966272 }
 0x2a1   :  { %1732 = dma.done.wait [#allocation10], 1024  }
 0x2a2   :  { %1733 = vsyncadd [#allocation10], 4294966272 }
 0x2a3   :  { %1435 = vsyncpa [#allocation3], 1 }
 0x2a4   :  { %1436 = vsyncpa [#allocation6], 1 }
 0x2a5   :  { %1437 = vsyncpa [#allocation4], 1 }
 0x2a6   :  { %1438 = vsyncpa [#allocation10], 1 }

</bundles_post_ra>
